<compile_context>
chip_gen: v5e
topology: v5e:2x2
jax: 0.10.0
libtpu: 0.0.40
codegen_flags: <defaults>
</compile_context>

<pallas_src>
import functools

import jax
import jax.numpy as jnp
from jax.experimental import pallas as pl
from jax.experimental.pallas import tpu as pltpu

LANE = 128
TARGET_TILE_BYTES = 4 * 1024 * 1024   # ~4 MiB DMA tile per input per step
CHUNK_ROWS = 512                      # inner compute chunk (multiple of 32)


def _round_down(x, m):
    return (x // m) * m


def _sublane_packing(dtype):
    # Rows per packed (8,128) vreg group: 8 for 4-byte, 16 for 2-byte, 32 for 1-byte.
    itemsize = jnp.dtype(dtype).itemsize
    return max(8, 8 * (4 // max(1, itemsize)))


def _num_tensorcores_per_chip():
    # Dual-TensorCore chips (v4/v5p "megacore", v7x) shard a "parallel" grid
    # axis across both cores; v2/v3/v5e/v6e devices expose a single TC.
    try:
        kind = jax.devices()[0].device_kind.lower().replace(" ", "")
    except Exception:
        return 1
    for tag in ("v4", "v5p", "v7", "tpu7"):
        if tag in kind:
            return 2
    return 1


def _stable_bce_f32(x, y):
    """max(x,0) - x*y + log1p(exp(-|x|)) in f32 using only exp/log/where.

    For t = exp(-|x|) < 1e-3 the first-order series log1p(t) ~= t is accurate
    to <6e-7 absolute (avoids the 1+tiny cancellation); elsewhere log(1+t) is
    exact to f32 rounding.  Keeps log1p-level accuracy without relying on a
    jnp.log1p lowering inside the kernel.
    """
    x = x.astype(jnp.float32)
    y = y.astype(jnp.float32)
    t = jnp.exp(-jnp.abs(x))
    log1p_t = jnp.where(t < 1e-3, t, jnp.log(1.0 + t))
    return jnp.maximum(x, 0.0) - x * y + log1p_t


def _bce_partial_sum_kernel(pred_ref, true_ref, part_ref, *, chunk_rows, num_chunks):
    """Accumulates (8,128) vreg-granule partial BCE sums into a resident output block."""
    i = pl.program_id(1)

    @pl.when(i == 0)
    def _init():
        part_ref[...] = jnp.zeros_like(part_ref)

    def body(c, acc):
        r0 = pl.multiple_of(c * chunk_rows, chunk_rows)
        x = pred_ref[pl.ds(r0, chunk_rows), :]
        y = true_ref[pl.ds(r0, chunk_rows), :]
        bce = _stable_bce_f32(x, y)
        # Reduce only across whole (8,128) vreg granules -> pure VPU adds; the
        # expensive cross-lane/sublane reduce happens once, outside the kernel.
        return acc + jnp.sum(bce.reshape(-1, 8, LANE), axis=0)

    part_ref[...] += jax.lax.fori_loop(
        0, num_chunks, body, jnp.zeros((8, LANE), jnp.float32))


def binary_focal_loss_with_logits(inputs, targets, *, alpha=0.25, gamma=2.0,
                                  reduction=True):
    assert inputs.shape == targets.shape
    n = inputs.size
    assert n > 0

    pred = inputs.reshape(-1)
    true = targets.reshape(-1)

    num_slices = _num_tensorcores_per_chip()
    sub = max(_sublane_packing(inputs.dtype), _sublane_packing(targets.dtype))
    max_itemsize = max(jnp.dtype(inputs.dtype).itemsize,
                       jnp.dtype(targets.dtype).itemsize)
    target_rows = max(CHUNK_ROWS,
                      _round_down(TARGET_TILE_BYTES // (LANE * max_itemsize),
                                  CHUNK_ROWS))

    rows_all = n // LANE
    lane_aligned = (rows_all * LANE == n)

    bce_sum = jnp.zeros((), jnp.float32)
    rows_covered = 0

    if rows_all >= sub * num_slices:
        per_slice_rows = rows_all // num_slices
        if per_slice_rows >= CHUNK_ROWS:
            tiles_est = pl.cdiv(per_slice_rows, target_rows)
            tile_rows = max(CHUNK_ROWS,
                            _round_down(per_slice_rows // tiles_est, CHUNK_ROWS))
            chunk_rows = CHUNK_ROWS
        else:
            tile_rows = _round_down(per_slice_rows, sub)
            chunk_rows = tile_rows
        tiles_per_slice = per_slice_rows // tile_rows
        num_chunks = tile_rows // chunk_rows
        rows_covered = tile_rows * tiles_per_slice * num_slices

        if lane_aligned:
            pred2d = pred.reshape(rows_all, LANE)   # free reshape of the buffer
            true2d = true.reshape(rows_all, LANE)
        else:
            # Ragged lane count: one prefix slice per input (still far cheaper
            # than the previous full zero-pad of both inputs + masked kernel).
            pred2d = pred[: rows_all * LANE].reshape(rows_all, LANE)
            true2d = true[: rows_all * LANE].reshape(rows_all, LANE)

        kernel = functools.partial(_bce_partial_sum_kernel,
                                   chunk_rows=chunk_rows, num_chunks=num_chunks)
        in_map = lambda c, i: (c * tiles_per_slice + i, 0)

        partials = pl.pallas_call(
            kernel,
            out_shape=jax.ShapeDtypeStruct((num_slices * 8, LANE), jnp.float32),
            grid_spec=pltpu.PrefetchScalarGridSpec(
                num_scalar_prefetch=0,
                grid=(num_slices, tiles_per_slice),
                in_specs=[
                    pl.BlockSpec((tile_rows, LANE), in_map),
                    pl.BlockSpec((tile_rows, LANE), in_map),
                ],
                out_specs=pl.BlockSpec((8, LANE), lambda c, i: (c, 0)),
            ),
            compiler_params=pltpu.CompilerParams(
                dimension_semantics=("parallel", "arbitrary"),
                vmem_limit_bytes=48 * 1024 * 1024),
        )(pred2d, true2d)
        bce_sum = bce_sum + jnp.sum(partials)

    n_covered = rows_covered * LANE
    if n_covered < n:
        # Ragged remainder (< one tile per core plus <128 lane elements):
        # negligible work, handled by plain XLA and added to the partial sum.
        bce_sum = bce_sum + jnp.sum(_stable_bce_f32(pred[n_covered:],
                                                    true[n_covered:]))

    # Scalar epilogue: exact mean divisor (Python float64 1/N), then the focal
    # weighting on the scalar mean BCE — matches PyTorch, where
    # BCEWithLogitsLoss already reduced to a scalar before the focal factor.
    bce_mean = bce_sum * jnp.float32(1.0 / float(n))
    bce_exp = jnp.exp(-bce_mean)
    focal = jnp.float32(alpha) * (1.0 - bce_exp) ** jnp.float32(gamma) * bce_mean
    del reduction  # .mean() of a scalar is a no-op either way.
    return focal


def _reference(inputs, targets, alpha=0.25, gamma=2.0):
    x = inputs.reshape(-1).astype(jnp.float32)
    y = targets.reshape(-1).astype(jnp.float32)
    bce = jnp.mean(jnp.maximum(x, 0.0) - x * y + jnp.log1p(jnp.exp(-jnp.abs(x))))
    bce_exp = jnp.exp(-bce)
    return alpha * (1.0 - bce_exp) ** gamma * bce


if __name__ == "__main__":
    key = jax.random.PRNGKey(0)
    k1, k2 = jax.random.split(key)
    # Small NCHW-like logits/targets: batch=2, channels=4, spatial=16x16.
    shape = (2, 4, 16, 16)
    logits = jax.random.normal(k1, shape, dtype=jnp.float32)
    targets = jax.random.bernoulli(k2, 0.5, shape).astype(jnp.float32)

    loss = binary_focal_loss_with_logits(logits, targets)
    loss = jax.block_until_ready(loss)

    ref = _reference(logits, targets)
    assert jnp.allclose(loss, ref, rtol=1e-5, atol=1e-6), (loss, ref)
    print("KERNEL_OK")
</pallas_src>

<mosaic_0001>
module attributes {stable_mosaic.version = 11 : i64} {
  func.func @_bce_partial_sum_kernel(%arg0: i32, %arg1: i32, %arg2: memref<16x128xf32, #tpu.memory_space<vmem>>, %arg3: memref<16x128xf32, #tpu.memory_space<vmem>>, %arg4: memref<8x128xf32, #tpu.memory_space<vmem>>) attributes {dimension_semantics = [#tpu.dimension_semantics<parallel>, #tpu.dimension_semantics<arbitrary>], iteration_bounds = array<i64: 1, 1>, scalar_prefetch = 0 : i64, scratch_operands = 0 : i64, tpu.core_type = #tpu.core_type<tc>, window_params = [{transform_indices = @transform_0, window_bounds = array<i64: 16, 128>}, {transform_indices = @transform_1, window_bounds = array<i64: 16, 128>}, {transform_indices = @transform_2, window_bounds = array<i64: 8, 128>}]} {
    %c0_i32 = arith.constant 0 : i32
    %0 = arith.cmpi eq, %arg1, %c0_i32 : i32
    %1 = arith.extui %0 : i1 to i32
    %c0_i32_0 = arith.constant 0 : i32
    %2 = arith.cmpi ne, %1, %c0_i32_0 : i32
    scf.if %2 {
      %cst_12 = arith.constant 0.000000e+00 : f32
      %31 = vector.broadcast %cst_12 : f32 to vector<8x128xf32>
      %c0_13 = arith.constant 0 : index
      %c0_14 = arith.constant 0 : index
      %32 = vector.load %arg4[%c0_13, %c0_14] : memref<8x128xf32, #tpu.memory_space<vmem>>, vector<8x128xf32>
      tpu.vector_store %arg4[%c0_13, %c0_14], %31 {strides = array<i32>} : memref<8x128xf32, #tpu.memory_space<vmem>>, vector<8x128xf32>,
    } else {
    }
    %c0 = arith.constant 0 : index
    %c0_1 = arith.constant 0 : index
    %3 = vector.load %arg4[%c0, %c0_1] : memref<8x128xf32, #tpu.memory_space<vmem>>, vector<8x128xf32>
    %cst = arith.constant 0.000000e+00 : f32
    %4 = vector.broadcast %cst : f32 to vector<8x128xf32>
    %c0_i32_2 = arith.constant 0 : i32
    %c16_i32 = arith.constant 16 : i32
    %5 = arith.muli %c0_i32_2, %c16_i32 : i32
    %6 = tpu.assume_multiple %5, 16 : i32
    %7 = arith.index_cast %6 : i32 to index
    %c0_3 = arith.constant 0 : index
    %8 = vector.load %arg2[%7, %c0_3] : memref<16x128xf32, #tpu.memory_space<vmem>>, vector<16x128xf32>
    %9 = arith.index_cast %6 : i32 to index
    %c0_4 = arith.constant 0 : index
    %10 = vector.load %arg3[%9, %c0_4] : memref<16x128xf32, #tpu.memory_space<vmem>>, vector<16x128xf32>
    %11 = math.absf %8 : vector<16x128xf32>
    %cst_5 = arith.constant 0.000000e+00 : f32
    %12 = vector.broadcast %cst_5 : f32 to vector<16x128xf32>
    %13 = arith.subf %12, %11 : vector<16x128xf32>
    %14 = math.exp %13 : vector<16x128xf32>
    %cst_6 = arith.constant 1.000000e-03 : f32
    %15 = vector.broadcast %cst_6 : f32 to vector<16x128xf32>
    %16 = arith.cmpf olt, %14, %15 : vector<16x128xf32>
    %cst_7 = arith.constant 1.000000e+00 : f32
    %17 = vector.broadcast %cst_7 : f32 to vector<16x128xf32>
    %18 = arith.addf %17, %14 : vector<16x128xf32>
    %19 = math.log %18 : vector<16x128xf32>
    %20 = arith.select %16, %14, %19 : vector<16x128xi1>, vector<16x128xf32>
    %cst_8 = arith.constant 0.000000e+00 : f32
    %21 = vector.broadcast %cst_8 : f32 to vector<16x128xf32>
    %22 = arith.maximumf %8, %21 : vector<16x128xf32>
    %23 = arith.mulf %8, %10 : vector<16x128xf32>
    %24 = arith.subf %22, %23 : vector<16x128xf32>
    %25 = arith.addf %24, %20 : vector<16x128xf32>
    %26 = vector.shape_cast %25 : vector<16x128xf32> to vector<2x8x128xf32>
    %cst_9 = arith.constant dense<0.000000e+00> : vector<8x128xf32>
    %27 = vector.multi_reduction <add>, %26, %cst_9 [0] : vector<2x8x128xf32> to vector<8x128xf32>
    %28 = arith.addf %4, %27 : vector<8x128xf32>
    %c1_i32 = arith.constant 1 : i32
    %29 = arith.addf %3, %28 : vector<8x128xf32>
    %c0_10 = arith.constant 0 : index
    %c0_11 = arith.constant 0 : index
    %30 = vector.load %arg4[%c0_10, %c0_11] : memref<8x128xf32, #tpu.memory_space<vmem>>, vector<8x128xf32>
    tpu.vector_store %arg4[%c0_10, %c0_11], %29 {strides = array<i32>} : memref<8x128xf32, #tpu.memory_space<vmem>>, vector<8x128xf32>,
    return
  }
  func.func @transform_0(%arg0: i32, %arg1: i32) -> (i32, i32) {
    %c1_i32 = arith.constant 1 : i32
    %0 = arith.muli %arg0, %c1_i32 : i32
    %1 = arith.addi %0, %arg1 : i32
    %c0_i32 = arith.constant 0 : i32
    %c0_i32_0 = arith.constant 0 : i32
    return %1, %c0_i32 : i32, i32
  }
  func.func @transform_1(%arg0: i32, %arg1: i32) -> (i32, i32) {
    %c1_i32 = arith.constant 1 : i32
    %0 = arith.muli %arg0, %c1_i32 : i32
    %1 = arith.addi %0, %arg1 : i32
    %c0_i32 = arith.constant 0 : i32
    %c0_i32_0 = arith.constant 0 : i32
    return %1, %c0_i32 : i32, i32
  }
  func.func @transform_2(%arg0: i32, %arg1: i32) -> (i32, i32) {
    %c0_i32 = arith.constant 0 : i32
    %c0_i32_0 = arith.constant 0 : i32
    return %arg0, %c0_i32 : i32, i32
  }
}

</mosaic_0001>

<bundles_post_ra>
// kernel: tpu_custom_call.1
= control target key start
LH: loop header
LB: loop body
LE: loop exit
PB: predicated region body
PF: predicated region fallthrough
CT: control target
= control target key end

     0   :  { %7 = vsyncpa [#allocation3], 0  ;;  %s235_s0 = inlined_call_operand.hbm [shape: f32[16,128], index: 0, kind: input, shape index: {}]   ;;  %s236_s1 = inlined_call_operand.hbm [shape: f32[16,128], index: 1, kind: input, shape index: {}]   ;;  %s237_s2 = inlined_call_operand.hbm [shape: f32[8,128], index: 2, kind: output, shape index: {}]  }
   0x1   :  { %8 = vsyncpa [#allocation6], 0 }
   0x2   :  { %9 = vsyncpa [#allocation4], 0  ;;  %s18_s11 = sshll.u32 %s235_s0, 4  ;;  %s206_s12 = smov [#allocation2]   ;;  %s19_s11 = int_to_ptr.hbm [resolvable:$true] %s18_s11 }
   0x3   :  { %s20_s13 = sshll.u32 %s206_s12, 4  ;;  %s35_s16 = sshll.u32 %s236_s1, 4  ;;  %s21_s13 = int_to_ptr.vmem [resolvable:$true] %s20_s13  ;;  %s36_s16 = int_to_ptr.hbm [resolvable:$true] %s35_s16 }
   0x4   :  { %s207_s17 = smov 128   ;;  %s208_s18 = smov 8  }
   0x5   :  { %26 = dma.hbm_to_vmem [thread:$0]  %s19_s11, 256, %s21_s13, [#allocation3], %s207_s17, %s207_s17, %s208_s18  }
   0x6   :  { %s209_s19 = smov [#allocation5]  }
   0x7   :  { %s37_s20 = sshll.u32 %s209_s19, 4  ;;  %s38_s20 = int_to_ptr.vmem [resolvable:$true] %s37_s20 }
   0x8   :  { %43 = dma.hbm_to_vmem [thread:$0]  %s36_s16, 256, %s38_s20, [#allocation6], %s207_s17, %s207_s17, %s208_s18  }
   0x9   :  { %200 = dma.done.wait [#allocation3], 256  }
   0xa   :  { %201 = vsyncadd [#allocation3], 4294967040 }
   0xb   :  { %202 = dma.done.wait [#allocation6], 256  }
   0xc   :  { %203 = vsyncadd [#allocation6], 4294967040  ;;  %v62_v0 = vld [vmem:[#allocation2] sm:$0xff]  ;;  %v63_v1 = vld [vmem:[#allocation2 + $0x8] sm:$0xff]  ;;  %s210_s0 = smov [#allocation7]   ;;  %s103_s23 = sshll.u32 %s237_s2, 4  ;;  %s104_s23 = int_to_ptr.hbm [resolvable:$true] %s103_s23 }
   0xd   :  { %v66_v2 = vand.u32 2147483647, %v62_v0  ;;  %v67_v3 = vand.u32 2147483647, %v63_v1  ;;  %v64_v11 = vld [vmem:[#allocation5] sm:$0xff]  ;;  %v65_v13 = vld [vmem:[#allocation5 + $0x8] sm:$0xff] }
   0xe   :  { %v84_v14 = vmax.f32 %v62_v0, 0.0  ;;  %v86_v15 = vmul.f32 %v64_v11, %v62_v0  ;;  %v85_v16 = vmax.f32 %v63_v1, 0.0  ;;  %v87_v17 = vmul.f32 %v65_v13, %v63_v1  ;;  %s101_s1 = sshll.u32 %s210_s0, 4  ;;  %s102_s1 = int_to_ptr.vmem [resolvable:$true] %s101_s1 }
   0xf   :  { %v68_v4 = vsub.f32 0.0, %v66_v2  ;;  %v69_v5 = vsub.f32 0.0, %v67_v3 }
  0x10   :  { %v88_v19 = vsub.f32 %v84_v14, %v86_v15  ;;  %v89_v22 = vsub.f32 %v85_v16, %v87_v17 }
  0x11   :  { %v70_v6 = vmul.f32 1.442695, %v68_v4  ;;  %v72_v7 = vmul.f32 1.442695, %v69_v5 }
  0x13   :  { %120 = vpow2.f32 %v70_v6 }
  0x14   :  { %122 = vpow2.f32 %v72_v7 }
  0x19   :  { %v121_v8 = vpop.eup %120 }
  0x1a   :  { %v123_v9 = vpop.eup %122  ;;  %v76_v10 = vadd.f32 1.0, %v121_v8  ;;  %vm74_vm0 = vcmp.lt.f32.partialorder %v121_v8, 0.001 }
  0x1b   :  { %v77_v12 = vadd.f32 1.0, %v123_v9  ;;  %vm75_vm1 = vcmp.lt.f32.partialorder %v123_v9, 0.001 }
  0x1c   :  { %124 = vlog2.f32 %v76_v10 }
  0x1d   :  { %126 = vlog2.f32 %v77_v12 }
  0x22   :  { %v125_v18 = vpop.eup %124 }
  0x23   :  { %v127_v20 = vpop.eup %126  ;;  %v79_v21 = vmul.f32 0.6931472, %v125_v18 }
  0x24   :  { %v81_v23 = vmul.f32 0.6931472, %v127_v20 }
  0x25   :  { %v82_v24 = vsel %vm74_vm0, %v121_v8, %v79_v21 }
  0x26   :  { %v83_v25 = vsel %vm75_vm1, %v123_v9, %v81_v23  ;;  %v90_v26 = vadd.f32 %v88_v19, %v82_v24 }
  0x27   :  { %v91_v27 = vadd.f32 %v89_v22, %v83_v25 }
  0x29   :  { %v92_v28 = vadd.f32 %v91_v27, %v90_v26 }
  0x2b   :  { %95 = vst [vmem:[#allocation7] sm:$0xff] %v92_v28 }
  0x2c   :  { %106 = dma.vmem_to_hbm [thread:$0]  %s102_s1, 128, %s104_s23, [#allocation4]  }
  0x2d   :  { %204 = dma.done.wait [#allocation4], 128  }
  0x2e   :  { %205 = vsyncadd [#allocation4], 4294967168 }
  0x2f   :  { %111 = vsyncpa [#allocation3], 1 }
  0x30   :  { %112 = vsyncpa [#allocation6], 1 }
  0x31   :  { %113 = vsyncpa [#allocation4], 1 }

</bundles_post_ra>
